<compile_context>
chip_gen: v7x
topology: tpu7x:2x2x1
jax: 0.10.0
libtpu: 0.0.40
codegen_flags: <defaults>
</compile_context>

<pallas_src>
import functools

import jax
import jax.numpy as jnp
from jax.experimental import pallas as pl
from jax.experimental.pallas import tpu as pltpu

_LANE = 128
_SUBLANE = 8


def _round_up(x, m):
    return (x + m - 1) // m * m


def _pad2d(x, rows, cols):
    r, c = x.shape
    return jnp.pad(x, ((0, rows - r), (0, cols - c)))


# ---------------------------------------------------------------------------
# Fused kernel: fc_pool + ReLU, masked max aggregation, fc_self+fc_neigh,
# LayerNorm.  grid = (dst_tiles, src_tiles); src is the reduction axis (last).
# ---------------------------------------------------------------------------
def _gsage_kernel(adj_ref, hs_ref, hd_ref, wp_ref, bp_ref, ws_ref, wn_ref,
                  b_ref, g_ref, bt_ref, o_ref, neigh_acc, pooled_buf, *, nhid):
    si = pl.program_id(1)

    # Running-max accumulator initialized to 0: ReLU guarantees pooled >= 0, so
    # the 0 floor never overrides a real neighbor max and yields 0 for
    # zero-in-degree nodes (DGL 'pool' behaviour).
    @pl.when(si == 0)
    def _init():
        neigh_acc[...] = jnp.zeros_like(neigh_acc)

    # fc_pool + ReLU for the current SOURCE tile (bf16 MXU inputs, f32 acc).
    pooled = jnp.dot(hs_ref[...], wp_ref[...], preferred_element_type=jnp.float32)
    pooled = jnp.maximum(pooled + bp_ref[...], 0.0)
    pooled_buf[...] = pooled
    # TODO(synk): on v6e/v7x keep pooled_buf / neigh_acc in bf16 (exact for max)
    # to halve vreg/VMEM pressure; kept f32 so v5e (no bf16 VPU) stays fast.

    adjf = adj_ref[...].astype(jnp.float32)                        # [Td, Ts], 0/1
    td, ts = adjf.shape
    lane_ids = jax.lax.broadcasted_iota(jnp.int32, (1, ts), 1)     # hoisted

    # Masked max over sources, fully 2-D:
    #   neigh[d, :] = max_s adj[d, s] * pooled[s, :]
    # Exact because adjacency is binary (wrapper binarizes) and pooled >= 0.
    def src_body(s, acc):
        onehot = (lane_ids == s).astype(jnp.float32)               # [1, Ts]
        acol = jnp.max(adjf * onehot, axis=1, keepdims=True)       # [Td, 1] = adj[:, s]
        prow = pooled_buf[pl.ds(s, 1), :]                          # [1, Fp]
        return jnp.maximum(acc, acol * prow)                       # [Td, Fp]

    neigh_acc[...] = jax.lax.fori_loop(0, ts, src_body, neigh_acc[...], unroll=8)

    # Finalize on the last source tile: two accumulated MXU matmuls + LayerNorm.
    @pl.when(si == pl.num_programs(1) - 1)
    def _finish():
        rst = jnp.dot(hd_ref[...], ws_ref[...], preferred_element_type=jnp.float32)
        rst = rst + jnp.dot(neigh_acc[...].astype(jnp.bfloat16), wn_ref[...],
                            preferred_element_type=jnp.float32)
        rst = rst + b_ref[...]

        # Masked LayerNorm over the first `nhid` (real) lanes.  Padded lanes of
        # rst are exactly 0 (zero-padded weights / bias), so sums are exact.
        lane = jax.lax.broadcasted_iota(jnp.int32, rst.shape, 1)
        inv_n = jnp.float32(1.0 / nhid)
        mean = jnp.sum(rst, axis=-1, keepdims=True) * inv_n
        ctr = jnp.where(lane < nhid, rst - mean, 0.0)
        var = jnp.sum(ctr * ctr, axis=-1, keepdims=True) * inv_n
        normed = ctr * jax.lax.rsqrt(var + jnp.float32(1e-5))
        o_ref[...] = (normed * g_ref[...] + bt_ref[...]).astype(o_ref.dtype)


# ---------------------------------------------------------------------------
# Wrapper
# ---------------------------------------------------------------------------
def gsage_layer_forward(adj, h, params):
    """adj: [N, N], adj[dst, src] != 0 for an edge src->dst; h: [N, nfeat].

    Returns LayerNorm(SAGEConv_pool(adj, h)) with shape [N, nhid] (float32).
    """
    n, nfeat = h.shape
    nhid = params["w_self"].shape[0]

    # Geometry: lane-dense (x128) features, row tiles capped at 128 so the
    # "parallel" dst axis can shard across the 2 TensorCores on v7x.
    row_tile = _round_up(n, _SUBLANE) if n <= 128 else 128
    np_ = _round_up(n, row_tile)
    fp = _round_up(nfeat, _LANE)
    # TODO(synk): on v6e/v7x pad hp to a 256 multiple when nhid > 128 (full MXU
    # output width); 128 is already optimal on v5e and for nhid <= 128.
    hp = _round_up(nhid, _LANE)
    nt = np_ // row_tile

    # Zero-padding keeps every matmul / reduction exact; bf16 only on MXU inputs.
    adj_p = _pad2d((adj > 0).astype(jnp.int8), np_, np_)           # binary, int8
    h_p = _pad2d(h, np_, fp).astype(jnp.bfloat16)
    wp_t = _pad2d(params["w_pool"].T, fp, fp).astype(jnp.bfloat16)
    bp = _pad2d(params["b_pool"].reshape(1, -1), 1, fp).astype(jnp.float32)
    ws_t = _pad2d(params["w_self"].T, fp, hp).astype(jnp.bfloat16)
    wn_t = _pad2d(params["w_neigh"].T, fp, hp).astype(jnp.bfloat16)
    b = _pad2d(params["bias"].reshape(1, -1), 1, hp).astype(jnp.float32)
    gamma = _pad2d(params["gamma"].reshape(1, -1), 1, hp).astype(jnp.float32)
    beta = _pad2d(params["beta"].reshape(1, -1), 1, hp).astype(jnp.float32)

    # Explicit VMEM budget: double-buffered blocks + scratch, with headroom.
    blk_bytes = (row_tile * row_tile * 1        # adj tile (int8)
                 + 2 * row_tile * fp * 2        # h (src view + dst view, bf16)
                 + fp * fp * 2                  # W_pool^T
                 + fp * 4                       # b_pool
                 + 2 * fp * hp * 2              # W_self^T + W_neigh^T
                 + 3 * hp * 4                   # bias, gamma, beta
                 + row_tile * hp * 4)           # output tile
    scratch_bytes = 2 * row_tile * fp * 4
    vmem_limit = int(min((2 * blk_bytes + scratch_bytes) * 2 + (4 << 20), 64 << 20))

    out_p = pl.pallas_call(
        functools.partial(_gsage_kernel, nhid=nhid),
        out_shape=jax.ShapeDtypeStruct((np_, hp), jnp.float32),
        grid=(nt, nt),                                   # (dst tiles, src tiles)
        in_specs=[
            pl.BlockSpec((row_tile, row_tile), lambda d, s: (d, s)),  # adj (int8)
            pl.BlockSpec((row_tile, fp), lambda d, s: (s, 0)),        # h  (src rows)
            pl.BlockSpec((row_tile, fp), lambda d, s: (d, 0)),        # h  (dst rows)
            pl.BlockSpec((fp, fp), lambda d, s: (0, 0)),              # W_pool^T
            pl.BlockSpec((1, fp), lambda d, s: (0, 0)),               # b_pool
            pl.BlockSpec((fp, hp), lambda d, s: (0, 0)),              # W_self^T
            pl.BlockSpec((fp, hp), lambda d, s: (0, 0)),              # W_neigh^T
            pl.BlockSpec((1, hp), lambda d, s: (0, 0)),               # bias
            pl.BlockSpec((1, hp), lambda d, s: (0, 0)),               # gamma
            pl.BlockSpec((1, hp), lambda d, s: (0, 0)),               # beta
        ],
        out_specs=pl.BlockSpec((row_tile, hp), lambda d, s: (d, 0)),
        scratch_shapes=[pltpu.VMEM((row_tile, fp), jnp.float32),      # neigh running max
                        pltpu.VMEM((row_tile, fp), jnp.float32)],     # pooled (src tile)
        compiler_params=pltpu.CompilerParams(
            dimension_semantics=("parallel", "arbitrary"),
            vmem_limit_bytes=vmem_limit),
    )(adj_p, h_p, h_p, wp_t, bp, ws_t, wn_t, b, gamma, beta)

    return out_p[:n, :nhid]


# ---------------------------------------------------------------------------
# Pure-JAX reference (f32) for correctness checking
# ---------------------------------------------------------------------------
def gsage_layer_reference(adj, h, params):
    pooled = jax.nn.relu(h @ params["w_pool"].T + params["b_pool"])
    mask = adj > 0                                          # [dst, src]
    cand = jnp.where(mask[:, :, None], pooled[None, :, :], -jnp.inf)
    neigh = jnp.max(cand, axis=1)
    neigh = jnp.where(mask.any(axis=1, keepdims=True), neigh, 0.0)
    rst = h @ params["w_self"].T + neigh @ params["w_neigh"].T + params["bias"]
    mean = rst.mean(-1, keepdims=True)
    var = ((rst - mean) ** 2).mean(-1, keepdims=True)
    return (rst - mean) / jnp.sqrt(var + 1e-5) * params["gamma"] + params["beta"]


def init_params(key, nfeat, nhid):
    ks = jax.random.split(key, 5)
    scale_in = 1.0 / jnp.sqrt(nfeat)
    return {
        "w_pool": jax.random.uniform(ks[0], (nfeat, nfeat), jnp.float32,
                                     -scale_in, scale_in),
        "b_pool": jax.random.uniform(ks[1], (nfeat,), jnp.float32,
                                     -scale_in, scale_in),
        "w_self": jax.random.uniform(ks[2], (nhid, nfeat), jnp.float32,
                                     -scale_in, scale_in),
        "w_neigh": jax.random.uniform(ks[3], (nhid, nfeat), jnp.float32,
                                      -scale_in, scale_in),
        "bias": jnp.zeros((nhid,), jnp.float32),
        "gamma": jnp.ones((nhid,), jnp.float32),    # LayerNorm weight
        "beta": jnp.zeros((nhid,), jnp.float32),    # LayerNorm bias
    }


if __name__ == "__main__":
    key = jax.random.PRNGKey(0)
    k_adj, k_h, k_p = jax.random.split(key, 3)

    N, NFEAT, NHID = 8, 32, 32

    # Deterministic random graph (dense adjacency, adj[dst, src]); no self loops.
    adj = (jax.random.uniform(k_adj, (N, N)) < 0.35).astype(jnp.float32)
    adj = adj * (1.0 - jnp.eye(N, dtype=jnp.float32))

    h = jax.random.normal(k_h, (N, NFEAT), dtype=jnp.float32)
    params = init_params(k_p, NFEAT, NHID)

    out = gsage_layer_forward(adj, h, params)
    jax.block_until_ready(out)
    assert out.shape == (N, NHID)

    ref = gsage_layer_reference(adj, h, params)
    err = float(jnp.max(jnp.abs(out - ref)))
    assert err < 5e-2, f"max abs error vs reference too large: {err}"
    print("KERNEL_OK")
</pallas_src>

<mosaic_0001>
module attributes {stable_mosaic.version = 11 : i64} {
  func.func @_gsage_kernel(%arg0: i32, %arg1: i32, %arg2: memref<8x8xi8, #tpu.memory_space<vmem>>, %arg3: memref<8x128xbf16, #tpu.memory_space<vmem>>, %arg4: memref<8x128xbf16, #tpu.memory_space<vmem>>, %arg5: memref<128x128xbf16, #tpu.memory_space<vmem>>, %arg6: memref<1x128xf32, #tpu.memory_space<vmem>>, %arg7: memref<128x128xbf16, #tpu.memory_space<vmem>>, %arg8: memref<128x128xbf16, #tpu.memory_space<vmem>>, %arg9: memref<1x128xf32, #tpu.memory_space<vmem>>, %arg10: memref<1x128xf32, #tpu.memory_space<vmem>>, %arg11: memref<1x128xf32, #tpu.memory_space<vmem>>, %arg12: memref<8x128xf32, #tpu.memory_space<vmem>>, %arg13: memref<8x128xf32, #tpu.memory_space<vmem>>, %arg14: memref<8x128xf32, #tpu.memory_space<vmem>>) attributes {dimension_semantics = [#tpu.dimension_semantics<parallel>, #tpu.dimension_semantics<arbitrary>], iteration_bounds = array<i64: 1, 1>, scalar_prefetch = 0 : i64, scratch_operands = 2 : i64, tpu.core_type = #tpu.core_type<tc>, window_params = [{transform_indices = @transform_0, window_bounds = array<i64: 8, 8>}, {transform_indices = @transform_1, window_bounds = array<i64: 8, 128>}, {transform_indices = @transform_2, window_bounds = array<i64: 8, 128>}, {pipeline_mode = #tpu.pipeline_mode<synchronous>, transform_indices = @transform_3, window_bounds = array<i64: 128, 128>}, {pipeline_mode = #tpu.pipeline_mode<synchronous>, transform_indices = @transform_4, window_bounds = array<i64: 1, 128>}, {pipeline_mode = #tpu.pipeline_mode<synchronous>, transform_indices = @transform_5, window_bounds = array<i64: 128, 128>}, {pipeline_mode = #tpu.pipeline_mode<synchronous>, transform_indices = @transform_6, window_bounds = array<i64: 128, 128>}, {pipeline_mode = #tpu.pipeline_mode<synchronous>, transform_indices = @transform_7, window_bounds = array<i64: 1, 128>}, {pipeline_mode = #tpu.pipeline_mode<synchronous>, transform_indices = @transform_8, window_bounds = array<i64: 1, 128>}, {pipeline_mode = #tpu.pipeline_mode<synchronous>, transform_indices = @transform_9, window_bounds = array<i64: 1, 128>}, {transform_indices = @transform_10, window_bounds = array<i64: 8, 128>}]} {
    %c0_i32 = arith.constant 0 : i32
    %0 = arith.cmpi eq, %arg1, %c0_i32 : i32
    %1 = arith.extui %0 : i1 to i32
    %c0_i32_0 = arith.constant 0 : i32
    %2 = arith.cmpi ne, %1, %c0_i32_0 : i32
    scf.if %2 {
      %cst_34 = arith.constant 0.000000e+00 : f32
      %132 = vector.broadcast %cst_34 : f32 to vector<8x128xf32>
      %c0_35 = arith.constant 0 : index
      %c0_36 = arith.constant 0 : index
      %133 = vector.load %arg13[%c0_35, %c0_36] : memref<8x128xf32, #tpu.memory_space<vmem>>, vector<8x128xf32>
      tpu.vector_store %arg13[%c0_35, %c0_36], %132 {strides = array<i32>} : memref<8x128xf32, #tpu.memory_space<vmem>>, vector<8x128xf32>,
    } else {
    }
    %c0 = arith.constant 0 : index
    %c0_1 = arith.constant 0 : index
    %3 = vector.load %arg3[%c0, %c0_1] : memref<8x128xbf16, #tpu.memory_space<vmem>>, vector<8x128xbf16>
    %c0_2 = arith.constant 0 : index
    %c0_3 = arith.constant 0 : index
    %4 = vector.load %arg5[%c0_2, %c0_3] : memref<128x128xbf16, #tpu.memory_space<vmem>>, vector<128x128xbf16>
    %cst = arith.constant dense<0.000000e+00> : vector<8x128xf32>
    %5 = tpu.matmul %3, %4, %cst {dimension_numbers = #tpu.dot_dimension_numbers<[1], [0], [0], [1], [0, 0, 1, 1], [], []>} : vector<8x128xbf16>, vector<128x128xbf16>, vector<8x128xf32> -> vector<8x128xf32>
    %c0_4 = arith.constant 0 : index
    %c0_5 = arith.constant 0 : index
    %6 = vector.load %arg6[%c0_4, %c0_5] : memref<1x128xf32, #tpu.memory_space<vmem>>, vector<1x128xf32>
    %7 = vector.broadcast %6 : vector<1x128xf32> to vector<8x128xf32>
    %8 = arith.addf %5, %7 : vector<8x128xf32>
    %cst_6 = arith.constant 0.000000e+00 : f32
    %9 = vector.broadcast %cst_6 : f32 to vector<8x128xf32>
    %10 = arith.maximumf %8, %9 : vector<8x128xf32>
    %c0_7 = arith.constant 0 : index
    %c0_8 = arith.constant 0 : index
    %11 = vector.load %arg14[%c0_7, %c0_8] : memref<8x128xf32, #tpu.memory_space<vmem>>, vector<8x128xf32>
    tpu.vector_store %arg14[%c0_7, %c0_8], %10 {strides = array<i32>} : memref<8x128xf32, #tpu.memory_space<vmem>>, vector<8x128xf32>,
    %c0_9 = arith.constant 0 : index
    %c0_10 = arith.constant 0 : index
    %12 = vector.load %arg2[%c0_9, %c0_10] : memref<8x8xi8, #tpu.memory_space<vmem>>, vector<8x8xi8>
    %13 = arith.sitofp %12 : vector<8x8xi8> to vector<8x8xf32>
    %14 = tpu.iota {dimensions = array<i32: 1>} : vector<1x8xi32>
    %c0_11 = arith.constant 0 : index
    %c0_12 = arith.constant 0 : index
    %15 = vector.load %arg13[%c0_11, %c0_12] : memref<8x128xf32, #tpu.memory_space<vmem>>, vector<8x128xf32>
    %c0_i32_13 = arith.constant 0 : i32
    %16 = vector.broadcast %c0_i32_13 : i32 to vector<1x8xi32>
    %17 = arith.cmpi eq, %14, %16 : vector<1x8xi32>
    %18 = arith.extui %17 : vector<1x8xi1> to vector<1x8xi32>
    %19 = arith.sitofp %18 : vector<1x8xi32> to vector<1x8xf32>
    %20 = vector.broadcast %19 : vector<1x8xf32> to vector<8x8xf32>
    %21 = arith.mulf %13, %20 : vector<8x8xf32>
    %cst_14 = arith.constant dense<0xFF800000> : vector<8xf32>
    %22 = vector.multi_reduction <maximumf>, %21, %cst_14 [1] : vector<8x8xf32> to vector<8xf32>
    %23 = vector.shape_cast %22 : vector<8xf32> to vector<8x1xf32>
    %24 = arith.index_cast %c0_i32_13 : i32 to index
    %c0_15 = arith.constant 0 : index
    %25 = vector.load %arg14[%24, %c0_15] : memref<8x128xf32, #tpu.memory_space<vmem>>, vector<1x128xf32>
    %26 = vector.broadcast %23 : vector<8x1xf32> to vector<8x128xf32>
    %27 = vector.broadcast %25 : vector<1x128xf32> to vector<8x128xf32>
    %28 = arith.mulf %26, %27 : vector<8x128xf32>
    %29 = arith.maximumf %15, %28 : vector<8x128xf32>
    %c1_i32 = arith.constant 1 : i32
    %30 = vector.broadcast %c1_i32 : i32 to vector<1x8xi32>
    %31 = arith.cmpi eq, %14, %30 : vector<1x8xi32>
    %32 = arith.extui %31 : vector<1x8xi1> to vector<1x8xi32>
    %33 = arith.sitofp %32 : vector<1x8xi32> to vector<1x8xf32>
    %34 = vector.broadcast %33 : vector<1x8xf32> to vector<8x8xf32>
    %35 = arith.mulf %13, %34 : vector<8x8xf32>
    %cst_16 = arith.constant dense<0xFF800000> : vector<8xf32>
    %36 = vector.multi_reduction <maximumf>, %35, %cst_16 [1] : vector<8x8xf32> to vector<8xf32>
    %37 = vector.shape_cast %36 : vector<8xf32> to vector<8x1xf32>
    %38 = arith.index_cast %c1_i32 : i32 to index
    %c0_17 = arith.constant 0 : index
    %39 = vector.load %arg14[%38, %c0_17] : memref<8x128xf32, #tpu.memory_space<vmem>>, vector<1x128xf32>
    %40 = vector.broadcast %37 : vector<8x1xf32> to vector<8x128xf32>
    %41 = vector.broadcast %39 : vector<1x128xf32> to vector<8x128xf32>
    %42 = arith.mulf %40, %41 : vector<8x128xf32>
    %43 = arith.maximumf %29, %42 : vector<8x128xf32>
    %c2_i32 = arith.constant 2 : i32
    %44 = vector.broadcast %c2_i32 : i32 to vector<1x8xi32>
    %45 = arith.cmpi eq, %14, %44 : vector<1x8xi32>
    %46 = arith.extui %45 : vector<1x8xi1> to vector<1x8xi32>
    %47 = arith.sitofp %46 : vector<1x8xi32> to vector<1x8xf32>
    %48 = vector.broadcast %47 : vector<1x8xf32> to vector<8x8xf32>
    %49 = arith.mulf %13, %48 : vector<8x8xf32>
    %cst_18 = arith.constant dense<0xFF800000> : vector<8xf32>
    %50 = vector.multi_reduction <maximumf>, %49, %cst_18 [1] : vector<8x8xf32> to vector<8xf32>
    %51 = vector.shape_cast %50 : vector<8xf32> to vector<8x1xf32>
    %52 = arith.index_cast %c2_i32 : i32 to index
    %c0_19 = arith.constant 0 : index
    %53 = vector.load %arg14[%52, %c0_19] : memref<8x128xf32, #tpu.memory_space<vmem>>, vector<1x128xf32>
    %54 = vector.broadcast %51 : vector<8x1xf32> to vector<8x128xf32>
    %55 = vector.broadcast %53 : vector<1x128xf32> to vector<8x128xf32>
    %56 = arith.mulf %54, %55 : vector<8x128xf32>
    %57 = arith.maximumf %43, %56 : vector<8x128xf32>
    %c3_i32 = arith.constant 3 : i32
    %58 = vector.broadcast %c3_i32 : i32 to vector<1x8xi32>
    %59 = arith.cmpi eq, %14, %58 : vector<1x8xi32>
    %60 = arith.extui %59 : vector<1x8xi1> to vector<1x8xi32>
    %61 = arith.sitofp %60 : vector<1x8xi32> to vector<1x8xf32>
    %62 = vector.broadcast %61 : vector<1x8xf32> to vector<8x8xf32>
    %63 = arith.mulf %13, %62 : vector<8x8xf32>
    %cst_20 = arith.constant dense<0xFF800000> : vector<8xf32>
    %64 = vector.multi_reduction <maximumf>, %63, %cst_20 [1] : vector<8x8xf32> to vector<8xf32>
    %65 = vector.shape_cast %64 : vector<8xf32> to vector<8x1xf32>
    %66 = arith.index_cast %c3_i32 : i32 to index
    %c0_21 = arith.constant 0 : index
    %67 = vector.load %arg14[%66, %c0_21] : memref<8x128xf32, #tpu.memory_space<vmem>>, vector<1x128xf32>
    %68 = vector.broadcast %65 : vector<8x1xf32> to vector<8x128xf32>
    %69 = vector.broadcast %67 : vector<1x128xf32> to vector<8x128xf32>
    %70 = arith.mulf %68, %69 : vector<8x128xf32>
    %71 = arith.maximumf %57, %70 : vector<8x128xf32>
    %c4_i32 = arith.constant 4 : i32
    %72 = vector.broadcast %c4_i32 : i32 to vector<1x8xi32>
    %73 = arith.cmpi eq, %14, %72 : vector<1x8xi32>
    %74 = arith.extui %73 : vector<1x8xi1> to vector<1x8xi32>
    %75 = arith.sitofp %74 : vector<1x8xi32> to vector<1x8xf32>
    %76 = vector.broadcast %75 : vector<1x8xf32> to vector<8x8xf32>
    %77 = arith.mulf %13, %76 : vector<8x8xf32>
    %cst_22 = arith.constant dense<0xFF800000> : vector<8xf32>
    %78 = vector.multi_reduction <maximumf>, %77, %cst_22 [1] : vector<8x8xf32> to vector<8xf32>
    %79 = vector.shape_cast %78 : vector<8xf32> to vector<8x1xf32>
    %80 = arith.index_cast %c4_i32 : i32 to index
    %c0_23 = arith.constant 0 : index
    %81 = vector.load %arg14[%80, %c0_23] : memref<8x128xf32, #tpu.memory_space<vmem>>, vector<1x128xf32>
    %82 = vector.broadcast %79 : vector<8x1xf32> to vector<8x128xf32>
    %83 = vector.broadcast %81 : vector<1x128xf32> to vector<8x128xf32>
    %84 = arith.mulf %82, %83 : vector<8x128xf32>
    %85 = arith.maximumf %71, %84 : vector<8x128xf32>
    %c5_i32 = arith.constant 5 : i32
    %86 = vector.broadcast %c5_i32 : i32 to vector<1x8xi32>
    %87 = arith.cmpi eq, %14, %86 : vector<1x8xi32>
    %88 = arith.extui %87 : vector<1x8xi1> to vector<1x8xi32>
    %89 = arith.sitofp %88 : vector<1x8xi32> to vector<1x8xf32>
    %90 = vector.broadcast %89 : vector<1x8xf32> to vector<8x8xf32>
    %91 = arith.mulf %13, %90 : vector<8x8xf32>
    %cst_24 = arith.constant dense<0xFF800000> : vector<8xf32>
    %92 = vector.multi_reduction <maximumf>, %91, %cst_24 [1] : vector<8x8xf32> to vector<8xf32>
    %93 = vector.shape_cast %92 : vector<8xf32> to vector<8x1xf32>
    %94 = arith.index_cast %c5_i32 : i32 to index
    %c0_25 = arith.constant 0 : index
    %95 = vector.load %arg14[%94, %c0_25] : memref<8x128xf32, #tpu.memory_space<vmem>>, vector<1x128xf32>
    %96 = vector.broadcast %93 : vector<8x1xf32> to vector<8x128xf32>
    %97 = vector.broadcast %95 : vector<1x128xf32> to vector<8x128xf32>
    %98 = arith.mulf %96, %97 : vector<8x128xf32>
    %99 = arith.maximumf %85, %98 : vector<8x128xf32>
    %c6_i32 = arith.constant 6 : i32
    %100 = vector.broadcast %c6_i32 : i32 to vector<1x8xi32>
    %101 = arith.cmpi eq, %14, %100 : vector<1x8xi32>
    %102 = arith.extui %101 : vector<1x8xi1> to vector<1x8xi32>
    %103 = arith.sitofp %102 : vector<1x8xi32> to vector<1x8xf32>
    %104 = vector.broadcast %103 : vector<1x8xf32> to vector<8x8xf32>
    %105 = arith.mulf %13, %104 : vector<8x8xf32>
    %cst_26 = arith.constant dense<0xFF800000> : vector<8xf32>
    %106 = vector.multi_reduction <maximumf>, %105, %cst_26 [1] : vector<8x8xf32> to vector<8xf32>
    %107 = vector.shape_cast %106 : vector<8xf32> to vector<8x1xf32>
    %108 = arith.index_cast %c6_i32 : i32 to index
    %c0_27 = arith.constant 0 : index
    %109 = vector.load %arg14[%108, %c0_27] : memref<8x128xf32, #tpu.memory_space<vmem>>, vector<1x128xf32>
    %110 = vector.broadcast %107 : vector<8x1xf32> to vector<8x128xf32>
    %111 = vector.broadcast %109 : vector<1x128xf32> to vector<8x128xf32>
    %112 = arith.mulf %110, %111 : vector<8x128xf32>
    %113 = arith.maximumf %99, %112 : vector<8x128xf32>
    %c7_i32 = arith.constant 7 : i32
    %114 = vector.broadcast %c7_i32 : i32 to vector<1x8xi32>
    %115 = arith.cmpi eq, %14, %114 : vector<1x8xi32>
    %116 = arith.extui %115 : vector<1x8xi1> to vector<1x8xi32>
    %117 = arith.sitofp %116 : vector<1x8xi32> to vector<1x8xf32>
    %118 = vector.broadcast %117 : vector<1x8xf32> to vector<8x8xf32>
    %119 = arith.mulf %13, %118 : vector<8x8xf32>
    %cst_28 = arith.constant dense<0xFF800000> : vector<8xf32>
    %120 = vector.multi_reduction <maximumf>, %119, %cst_28 [1] : vector<8x8xf32> to vector<8xf32>
    %121 = vector.shape_cast %120 : vector<8xf32> to vector<8x1xf32>
    %122 = arith.index_cast %c7_i32 : i32 to index
    %c0_29 = arith.constant 0 : index
    %123 = vector.load %arg14[%122, %c0_29] : memref<8x128xf32, #tpu.memory_space<vmem>>, vector<1x128xf32>
    %124 = vector.broadcast %121 : vector<8x1xf32> to vector<8x128xf32>
    %125 = vector.broadcast %123 : vector<1x128xf32> to vector<8x128xf32>
    %126 = arith.mulf %124, %125 : vector<8x128xf32>
    %127 = arith.maximumf %113, %126 : vector<8x128xf32>
    %c8_i32 = arith.constant 8 : i32
    %c0_30 = arith.constant 0 : index
    %c0_31 = arith.constant 0 : index
    %128 = vector.load %arg13[%c0_30, %c0_31] : memref<8x128xf32, #tpu.memory_space<vmem>>, vector<8x128xf32>
    tpu.vector_store %arg13[%c0_30, %c0_31], %127 {strides = array<i32>} : memref<8x128xf32, #tpu.memory_space<vmem>>, vector<8x128xf32>,
    %c0_i32_32 = arith.constant 0 : i32
    %129 = arith.cmpi eq, %arg1, %c0_i32_32 : i32
    %130 = arith.extui %129 : i1 to i32
    %c0_i32_33 = arith.constant 0 : i32
    %131 = arith.cmpi ne, %130, %c0_i32_33 : i32
    scf.if %131 {
      %c0_34 = arith.constant 0 : index
      %c0_35 = arith.constant 0 : index
      %132 = vector.load %arg4[%c0_34, %c0_35] : memref<8x128xbf16, #tpu.memory_space<vmem>>, vector<8x128xbf16>
      %c0_36 = arith.constant 0 : index
      %c0_37 = arith.constant 0 : index
      %133 = vector.load %arg7[%c0_36, %c0_37] : memref<128x128xbf16, #tpu.memory_space<vmem>>, vector<128x128xbf16>
      %cst_38 = arith.constant dense<0.000000e+00> : vector<8x128xf32>
      %134 = tpu.matmul %132, %133, %cst_38 {dimension_numbers = #tpu.dot_dimension_numbers<[1], [0], [0], [1], [0, 0, 1, 1], [], []>} : vector<8x128xbf16>, vector<128x128xbf16>, vector<8x128xf32> -> vector<8x128xf32>
      %c0_39 = arith.constant 0 : index
      %c0_40 = arith.constant 0 : index
      %135 = vector.load %arg13[%c0_39, %c0_40] : memref<8x128xf32, #tpu.memory_space<vmem>>, vector<8x128xf32>
      %136 = arith.truncf %135 : vector<8x128xf32> to vector<8x128xbf16>
      %c0_41 = arith.constant 0 : index
      %c0_42 = arith.constant 0 : index
      %137 = vector.load %arg8[%c0_41, %c0_42] : memref<128x128xbf16, #tpu.memory_space<vmem>>, vector<128x128xbf16>
      %cst_43 = arith.constant dense<0.000000e+00> : vector<8x128xf32>
      %138 = tpu.matmul %136, %137, %cst_43 {dimension_numbers = #tpu.dot_dimension_numbers<[1], [0], [0], [1], [0, 0, 1, 1], [], []>} : vector<8x128xbf16>, vector<128x128xbf16>, vector<8x128xf32> -> vector<8x128xf32>
      %139 = arith.addf %134, %138 : vector<8x128xf32>
      %c0_44 = arith.constant 0 : index
      %c0_45 = arith.constant 0 : index
      %140 = vector.load %arg9[%c0_44, %c0_45] : memref<1x128xf32, #tpu.memory_space<vmem>>, vector<1x128xf32>
      %141 = vector.broadcast %140 : vector<1x128xf32> to vector<8x128xf32>
      %142 = arith.addf %139, %141 : vector<8x128xf32>
      %143 = tpu.iota {dimensions = array<i32: 1>} : vector<8x128xi32>
      %cst_46 = arith.constant dense<0.000000e+00> : vector<8xf32>
      %144 = vector.multi_reduction <add>, %142, %cst_46 [1] : vector<8x128xf32> to vector<8xf32>
      %145 = vector.shape_cast %144 : vector<8xf32> to vector<8x1xf32>
      %cst_47 = arith.constant 3.125000e-02 : f32
      %146 = vector.broadcast %cst_47 : f32 to vector<8x1xf32>
      %147 = arith.mulf %145, %146 : vector<8x1xf32>
      %c32_i32 = arith.constant 32 : i32
      %148 = vector.broadcast %c32_i32 : i32 to vector<8x128xi32>
      %149 = arith.cmpi slt, %143, %148 : vector<8x128xi32>
      %150 = vector.broadcast %147 : vector<8x1xf32> to vector<8x128xf32>
      %151 = arith.subf %142, %150 : vector<8x128xf32>
      %cst_48 = arith.constant 0.000000e+00 : f32
      %152 = vector.broadcast %cst_48 : f32 to vector<8x128xf32>
      %153 = arith.select %149, %151, %152 : vector<8x128xi1>, vector<8x128xf32>
      %154 = arith.mulf %153, %153 : vector<8x128xf32>
      %cst_49 = arith.constant dense<0.000000e+00> : vector<8xf32>
      %155 = vector.multi_reduction <add>, %154, %cst_49 [1] : vector<8x128xf32> to vector<8xf32>
      %156 = vector.shape_cast %155 : vector<8xf32> to vector<8x1xf32>
      %cst_50 = arith.constant 3.125000e-02 : f32
      %157 = vector.broadcast %cst_50 : f32 to vector<8x1xf32>
      %158 = arith.mulf %156, %157 : vector<8x1xf32>
      %cst_51 = arith.constant 9.99999974E-6 : f32
      %159 = vector.broadcast %cst_51 : f32 to vector<8x1xf32>
      %160 = arith.addf %158, %159 : vector<8x1xf32>
      %161 = math.rsqrt %160 : vector<8x1xf32>
      %162 = vector.broadcast %161 : vector<8x1xf32> to vector<8x128xf32>
      %163 = arith.mulf %153, %162 : vector<8x128xf32>
      %c0_52 = arith.constant 0 : index
      %c0_53 = arith.constant 0 : index
      %164 = vector.load %arg10[%c0_52, %c0_53] : memref<1x128xf32, #tpu.memory_space<vmem>>, vector<1x128xf32>
      %165 = vector.broadcast %164 : vector<1x128xf32> to vector<8x128xf32>
      %166 = arith.mulf %163, %165 : vector<8x128xf32>
      %c0_54 = arith.constant 0 : index
      %c0_55 = arith.constant 0 : index
      %167 = vector.load %arg11[%c0_54, %c0_55] : memref<1x128xf32, #tpu.memory_space<vmem>>, vector<1x128xf32>
      %168 = vector.broadcast %167 : vector<1x128xf32> to vector<8x128xf32>
      %169 = arith.addf %166, %168 : vector<8x128xf32>
      %c0_56 = arith.constant 0 : index
      %c0_57 = arith.constant 0 : index
      %170 = vector.load %arg12[%c0_56, %c0_57] : memref<8x128xf32, #tpu.memory_space<vmem>>, vector<8x128xf32>
      tpu.vector_store %arg12[%c0_56, %c0_57], %169 {strides = array<i32>} : memref<8x128xf32, #tpu.memory_space<vmem>>, vector<8x128xf32>,
    } else {
    }
    return
  }
  func.func @transform_0(%arg0: i32, %arg1: i32) -> (i32, i32) {
    %c0_i32 = arith.constant 0 : i32
    return %arg0, %arg1 : i32, i32
  }
  func.func @transform_1(%arg0: i32, %arg1: i32) -> (i32, i32) {
    %c0_i32 = arith.constant 0 : i32
    %c0_i32_0 = arith.constant 0 : i32
    return %arg1, %c0_i32 : i32, i32
  }
  func.func @transform_2(%arg0: i32, %arg1: i32) -> (i32, i32) {
    %c0_i32 = arith.constant 0 : i32
    %c0_i32_0 = arith.constant 0 : i32
    return %arg0, %c0_i32 : i32, i32
  }
  func.func @transform_3(%arg0: i32, %arg1: i32) -> (i32, i32) {
    %c0_i32 = arith.constant 0 : i32
    %c0_i32_0 = arith.constant 0 : i32
    %c0_i32_1 = arith.constant 0 : i32
    return %c0_i32, %c0_i32_0 : i32, i32
  }
  func.func @transform_4(%arg0: i32, %arg1: i32) -> (i32, i32) {
    %c0_i32 = arith.constant 0 : i32
    %c0_i32_0 = arith.constant 0 : i32
    %c0_i32_1 = arith.constant 0 : i32
    return %c0_i32, %c0_i32_0 : i32, i32
  }
  func.func @transform_5(%arg0: i32, %arg1: i32) -> (i32, i32) {
    %c0_i32 = arith.constant 0 : i32
    %c0_i32_0 = arith.constant 0 : i32
    %c0_i32_1 = arith.constant 0 : i32
    return %c0_i32, %c0_i32_0 : i32, i32
  }
  func.func @transform_6(%arg0: i32, %arg1: i32) -> (i32, i32) {
    %c0_i32 = arith.constant 0 : i32
    %c0_i32_0 = arith.constant 0 : i32
    %c0_i32_1 = arith.constant 0 : i32
    return %c0_i32, %c0_i32_0 : i32, i32
  }
  func.func @transform_7(%arg0: i32, %arg1: i32) -> (i32, i32) {
    %c0_i32 = arith.constant 0 : i32
    %c0_i32_0 = arith.constant 0 : i32
    %c0_i32_1 = arith.constant 0 : i32
    return %c0_i32, %c0_i32_0 : i32, i32
  }
  func.func @transform_8(%arg0: i32, %arg1: i32) -> (i32, i32) {
    %c0_i32 = arith.constant 0 : i32
    %c0_i32_0 = arith.constant 0 : i32
    %c0_i32_1 = arith.constant 0 : i32
    return %c0_i32, %c0_i32_0 : i32, i32
  }
  func.func @transform_9(%arg0: i32, %arg1: i32) -> (i32, i32) {
    %c0_i32 = arith.constant 0 : i32
    %c0_i32_0 = arith.constant 0 : i32
    %c0_i32_1 = arith.constant 0 : i32
    return %c0_i32, %c0_i32_0 : i32, i32
  }
  func.func @transform_10(%arg0: i32, %arg1: i32) -> (i32, i32) {
    %c0_i32 = arith.constant 0 : i32
    %c0_i32_0 = arith.constant 0 : i32
    return %arg0, %c0_i32 : i32, i32
  }
}

</mosaic_0001>

<bundles_post_ra>
// kernel: tpu_custom_call.1
= control target key start
LH: loop header
LB: loop body
LE: loop exit
PB: predicated region body
PF: predicated region fallthrough
CT: control target
= control target key end

     0   :  { %15 = vsyncpa [#allocation5], 0  ;;  %s1138_s0 = inlined_call_operand.hbm [shape: s8[8,8], index: 0, kind: input, shape index: {}]   ;;  %s1139_s1 = inlined_call_operand.hbm [shape: bf16[8,128], index: 1, kind: input, shape index: {}]   ;;  %s1140_s2 = inlined_call_operand.vmem [shape: bf16[8,128], index: 2, kind: input, shape index: {}]   ;;  %s1141_s3 = inlined_call_operand.hbm [shape: bf16[128,128], index: 3, kind: input, shape index: {}]   ;;  %s1142_s4 = inlined_call_operand.vmem [shape: f32[1,128], index: 4, kind: input, shape index: {}]   ;;  %s1143_s5 = inlined_call_operand.hbm [shape: bf16[128,128], index: 5, kind: input, shape index: {}]   ;;  %s1144_s6 = inlined_call_operand.hbm [shape: bf16[128,128], index: 6, kind: input, shape index: {}]   ;;  %s1145_s7 = inlined_call_operand.vmem [shape: f32[1,128], index: 7, kind: input, shape index: {}]   ;;  %s1146_s8 = inlined_call_operand.vmem [shape: f32[1,128], index: 8, kind: input, shape index: {}]   ;;  %s1147_s9 = inlined_call_operand.vmem [shape: f32[1,128], index: 9, kind: input, shape index: {}]   ;;  %s1148_s10 = inlined_call_operand.hbm [shape: f32[8,128], index: 10, kind: output, shape index: {}]  }
   0x1   :  { %16 = vsyncpa [#allocation8], 0 }
   0x2   :  { %17 = vsyncpa [#allocation11], 0 }
   0x3   :  { %18 = vsyncpa [#allocation6], 0  ;;  %s916_s13 = smov [#allocation7]   ;;  %s776_s17 = scalar_lea.hbm %s1139_s1, 64 }
   0x4   :  { %s35_s14 = sshll.u32 %s916_s13, 4  ;;  %p777_p0 = scmp.ne.s32.totalorder %s1139_s1, %s776_s17  ;;  %s36_s14 = int_to_ptr.vmem [resolvable:$true] %s35_s14 }
   0x5   :  { %p780_p1 = scmp.lt.u32.totalorder %s776_s17, %s1139_s1 }
   0x7   :  { %p782_p2 = pnand %p780_p1, %p777_p0 }
   0x9   :  { %785 = shalt.err (!%p782_p2)
}
   0xa   :  { %s786_s22 = scalar_lea.vmem %s36_s14, 64  ;;  %p791_p4 = scmp.lt.s32.totalorder %s36_s14, %s36_s14 }
   0xb   :  { %p787_p3 = scmp.ne.s32.totalorder %s36_s14, %s786_s22  ;;  %p792_p5 = scmp.lt.s32.totalorder %s786_s22, %s786_s22 }
   0xd   :  { %p793_p6 = por %p792_p5, %p791_p4 }
   0xf   :  { %p794_p7 = pnand %p793_p6, %p787_p3 }
  0x11   :  { %797 = shalt.err (!%p794_p7)
}
  0x12   :  { %38 = dma.hbm_to_vmem [thread:$0]  %s1139_s1, 64, %s36_s14, [#allocation8]  }
  0x13   :  { %s917_s25 = smov [#allocation10]   ;;  %s918_s27 = smov [#allocation4]  }
  0x14   :  { %s60_s26 = sshll.u32 %s917_s25, 4  ;;  %s25_s28 = sshll.u32 %s918_s27, 4  ;;  %s61_s26 = int_to_ptr.vmem [resolvable:$true] %s60_s26  ;;  %s26_s28 = int_to_ptr.vmem [resolvable:$true] %s25_s28 }
  0x15   :  { %s798_s11 = scalar_lea.hbm %s1143_s5, 1024 }
  0x16   :  { %p799_p8 = scmp.ne.s32.totalorder %s1143_s5, %s798_s11  ;;  %p802_p9 = scmp.lt.u32.totalorder %s798_s11, %s1143_s5 }
  0x18   :  { %p804_p10 = pnand %p802_p9, %p799_p8 }
  0x1a   :  { %807 = shalt.err (!%p804_p10)
}
  0x1b   :  { %s808_s1 = scalar_lea.vmem %s61_s26, 1024  ;;  %p813_p12 = scmp.lt.s32.totalorder %s61_s26, %s61_s26 }
  0x1c   :  { %p809_p11 = scmp.ne.s32.totalorder %s61_s26, %s808_s1  ;;  %p814_p13 = scmp.lt.s32.totalorder %s808_s1, %s808_s1 }
  0x1e   :  { %p815_p0 = por %p814_p13, %p813_p12 }
  0x20   :  { %p816_p1 = pnand %p815_p0, %p809_p11 }
  0x22   :  { %819 = shalt.err (!%p816_p1)
}
  0x23   :  { %s919_s14 = smov 64   ;;  %s920_s17 = smov 4  }
  0x24   :  { %66 = dma.hbm_to_vmem [thread:$0]  %s1143_s5, 1024, %s61_s26, [#allocation11], %s919_s14, %s919_s14, %s920_s17  }
  0x25   :  { %s820_s22 = scalar_lea.hbm %s1138_s0, 32 }
  0x26   :  { %p821_p2 = scmp.ne.s32.totalorder %s1138_s0, %s820_s22  ;;  %p824_p3 = scmp.lt.u32.totalorder %s820_s22, %s1138_s0 }
  0x28   :  { %p826_p4 = pnand %p824_p3, %p821_p2 }
  0x2a   :  { %829 = shalt.err (!%p826_p4)
}
  0x2b   :  { %s830_s29 = scalar_lea.vmem %s26_s28, 32  ;;  %p835_p6 = scmp.lt.s32.totalorder %s26_s28, %s26_s28 }
  0x2c   :  { %p831_p5 = scmp.ne.s32.totalorder %s26_s28, %s830_s29  ;;  %p836_p7 = scmp.lt.s32.totalorder %s830_s29, %s830_s29 }
  0x2e   :  { %p837_p8 = por %p836_p7, %p835_p6 }
  0x30   :  { %p838_p9 = pnand %p837_p8, %p831_p5 }
  0x32   :  { %841 = shalt.err (!%p838_p9)
}
  0x33   :  { %28 = dma.hbm_to_vmem [thread:$0]  %s1138_s0, 32, %s26_s28, [#allocation5]  }
  0x34   :  { %s921_s30 = smov [#allocation9]   ;;  %s922_s12 = smov [#allocation12]  }
  0x35   :  { %s46_s11 = sshll.u32 %s921_s30, 4  ;;  %s72_s13 = sshll.u32 %s922_s12, 4  ;;  %s47_s11 = int_to_ptr.vmem [resolvable:$true] %s46_s11  ;;  %s73_s13 = int_to_ptr.vmem [resolvable:$true] %s72_s13 }
  0x36   :  { %s842_s1 = scalar_lea.hbm %s1141_s3, 1024 }
  0x37   :  { %p843_p10 = scmp.ne.s32.totalorder %s1141_s3, %s842_s1  ;;  %p846_p11 = scmp.lt.u32.totalorder %s842_s1, %s1141_s3 }
  0x39   :  { %p848_p12 = pnand %p846_p11, %p843_p10 }
  0x3b   :  { %851 = shalt.err (!%p848_p12)
}
  0x3c   :  { %s852_s0 = scalar_lea.vmem %s47_s11, 1024  ;;  %p857_p0 = scmp.lt.s32.totalorder %s47_s11, %s47_s11 }
  0x3d   :  { %p853_p13 = scmp.ne.s32.totalorder %s47_s11, %s852_s0  ;;  %p858_p1 = scmp.lt.s32.totalorder %s852_s0, %s852_s0 }
  0x3f   :  { %p859_p2 = por %p858_p1, %p857_p0 }
  0x41   :  { %p860_p3 = pnand %p859_p2, %p853_p13 }
  0x43   :  { %863 = shalt.err (!%p860_p3)
}
  0x44   :  { %52 = dma.hbm_to_vmem [thread:$0]  %s1141_s3, 1024, %s47_s11, [#allocation8], %s919_s14, %s919_s14, %s920_s17  }
  0x45   :  { %s864_s25 = scalar_lea.hbm %s1144_s6, 1024 }
  0x46   :  { %p865_p4 = scmp.ne.s32.totalorder %s1144_s6, %s864_s25  ;;  %p868_p5 = scmp.lt.u32.totalorder %s864_s25, %s1144_s6 }
  0x48   :  { %p870_p6 = pnand %p868_p5, %p865_p4 }
  0x4a   :  { %873 = shalt.err (!%p870_p6)
}
  0x4b   :  { %s874_s30 = scalar_lea.vmem %s73_s13, 1024  ;;  %p879_p8 = scmp.lt.s32.totalorder %s73_s13, %s73_s13 }
  0x4c   :  { %p875_p7 = scmp.ne.s32.totalorder %s73_s13, %s874_s30  ;;  %p880_p9 = scmp.lt.s32.totalorder %s874_s30, %s874_s30 }
  0x4e   :  { %p881_p10 = por %p880_p9, %p879_p8 }
  0x50   :  { %p882_p11 = pnand %p881_p10, %p875_p7 }
  0x52   :  { %885 = shalt.err (!%p882_p11)
}
  0x53   :  { %78 = dma.hbm_to_vmem [thread:$0]  %s1144_s6, 1024, %s73_s13, [#allocation11], %s919_s14, %s919_s14, %s920_s17  }
  0x54   :  { %908 = dma.done.wait [#allocation5], 32  }
  0x55   :  { %909 = vsyncadd [#allocation5], 4294967264 }
  0x56   :  { %910 = dma.done.wait [#allocation8], 1088  }
  0x57   :  { %911 = vsyncadd [#allocation8], 4294966208 }
  0x58   :  { %912 = dma.done.wait [#allocation11], 2048  }
  0x59   :  { %913 = vsyncadd [#allocation11], 4294965248  ;;  %v223_v0 = vlaneseq  ;;  %v923_v1 = vmov 0.0   ;;  %vm924_vm0 = vmmov 0   ;;  %v750_v3 = vld [vmem:[#allocation9] sm:$0xff]   ;;  %v751_v4 = vld [vmem:[#allocation9 + $0x8] sm:$0xff]  }
  0x5a   :  { %680 = vmatprep.subr.bf16.mxu0 %v923_v1  ;;  %696 = vmatprep.mubr.msk.bf16.mxu0 %vm924_vm0, %v923_v1  ;;  %vm230_vm5 = vcmask 64512   ;;  %v752_v8 = vld [vmem:[#allocation9 + $0x10] sm:$0xff]   ;;  %v220_v10 = vld [vmem:[#allocation4] sm:$0x3]  ;;  %v754_v16 = vld [vmem:[#allocation9 + $0x20] sm:$0xff]   ;;  %s925_s1 = smov [#allocation13]  }
  0x5b   :  { %700 = vmatprep.subr.bf16.mxu1 %v923_v1  ;;  %716 = vmatprep.mubr.msk.bf16.mxu1 %vm924_vm0, %v923_v1  ;;  %v1056_v2 = vand.u32 127, %v223_v0  ;;  %v753_v12 = vld [vmem:[#allocation9 + $0x18] sm:$0xff]   ;;  %v221_v13 = vunpack.c.0.s8 %v220_v10  ;;  %v755_v24 = vld [vmem:[#allocation9 + $0x28] sm:$0xff]   ;;  %v756_v34 = vld [vmem:[#allocation9 + $0x30] sm:$0xff]   ;;  %s598_s18 = sshll.u32 %s925_s1, 4  ;;  %s599_s18 = int_to_ptr.vmem [resolvable:$true] %s598_s18 }
  0x5c   :  { %681 = vmatpush3.bf16.msra.mxu0 %v750_v3  ;;  %v757_v37 = vld [vmem:[#allocation9 + $0x38] sm:$0xff]   ;;  %v758_v39 = vld [vmem:[#allocation10] sm:$0xff]   ;;  %v760_v41 = vld [vmem:[#allocation10 + $0x8] sm:$0xff]   ;;  %s886_s19 = scalar_lea.vmem %s599_s18, 128  ;;  %p891_p13 = scmp.lt.s32.totalorder %s599_s18, %s599_s18 }
  0x5d   :  { %vm255_vm1 = vcmp.eq.s32.totalorder %v1056_v2, 2  ;;  %vm226_vm2 = vcmp.eq.s32.totalorder %v1056_v2, 0  ;;  %vm269_vm3 = vcmp.eq.s32.totalorder %v1056_v2, 3  ;;  %682 = vmatprep.subr.bf16.mxu0 %v923_v1  ;;  %vm241_vm4 = vcmp.eq.s32.totalorder %v1056_v2, 1  ;;  %v106_v38 = vld [vmem:[#allocation7] sm:$0xf]  ;;  %p887_p12 = scmp.ne.s32.totalorder %s599_s18, %s886_s19  ;;  %p892_p0 = scmp.lt.s32.totalorder %s886_s19, %s886_s19 }
  0x5e   :  { %v622_v5 = vsel %vm255_vm1, 1.0, %v923_v1  ;;  %v618_v6 = vsel %vm226_vm2, 1.0, %v923_v1  ;;  %v624_v7 = vsel %vm269_vm3, 1.0, %v923_v1  ;;  %vm297_vm6 = vcmp.eq.s32.totalorder %v1056_v2, 5  ;;  %v759_v40 = vld [vmem:[#allocation12] sm:$0xff]   ;;  %v761_v42 = vld [vmem:[#allocation12 + $0x8] sm:$0xff]  }
  0x5f   :  { %vm283_vm7 = vcmp.eq.s32.totalorder %v1056_v2, 4  ;;  %v620_v9 = vsel %vm241_vm4, 1.0, %v923_v1  ;;  %vm325_vm8 = vcmp.eq.s32.totalorder %v1056_v2, 7  ;;  %v628_v11 = vsel %vm297_vm6, 1.0, %v923_v1  ;;  %701 = vmatpush3.bf16.msra.mxu1 %v759_v40  ;;  %v762_v43 = vld [vmem:[#allocation10 + $0x10] sm:$0xff]   ;;  %v764_v45 = vld [vmem:[#allocation10 + $0x18] sm:$0xff]   ;;  %p893_p1 = por %p892_p0, %p891_p13 }
  0x60   :  { %683 = vmatpush3.bf16.msra.mxu0 %v751_v4  ;;  %vm311_vm9 = vcmp.eq.s32.totalorder %v1056_v2, 6  ;;  %v626_v14 = vsel %vm283_vm7, 1.0, %v923_v1  ;;  %v222_v15 = vcvt.s32.f32 %v221_v13  ;;  %v632_v23 = vsel %vm325_vm8, 1.0, %v923_v1  ;;  %702 = vmatprep.subr.bf16.mxu1 %v923_v1  ;;  %v763_v44 = vld [vmem:[#allocation12 + $0x10] sm:$0xff]   ;;  %v765_v46 = vld [vmem:[#allocation12 + $0x18] sm:$0xff]   ;;  %v766_v47 = vld [vmem:[#allocation10 + $0x20] sm:$0xff]  }
  0x61   :  { %684 = vmatprep.subr.bf16.mxu0 %v923_v1  ;;  %v630_v27 = vsel %vm311_vm9, 1.0, %v923_v1  ;;  %v767_v48 = vld [vmem:[#allocation12 + $0x20] sm:$0xff]   ;;  %v768_v49 = vld [vmem:[#allocation10 + $0x28] sm:$0xff]   ;;  %v770_v51 = vld [vmem:[#allocation10 + $0x30] sm:$0xff]   ;;  %vm565_vm10 = vcmp.lt.s32.totalorder %v1056_v2, 32  ;;  %p894_p2 = pnand %p893_p1, %p887_p12 }
  0x62   :  { %v258_v17 = vmul.f32 %v622_v5, %v222_v15  ;;  %v229_v18 = vmul.f32 %v618_v6, %v222_v15  ;;  %v272_v19 = vmul.f32 %v624_v7, %v222_v15  ;;  %v244_v20 = vmul.f32 %v620_v9, %v222_v15  ;;  %v769_v50 = vld [vmem:[#allocation12 + $0x28] sm:$0xff]   ;;  %v771_v52 = vld [vmem:[#allocation12 + $0x30] sm:$0xff]   ;;  %v772_v53 = vld [vmem:[#allocation10 + $0x38] sm:$0xff]  }
  0x63   :  { %v300_v28 = vmul.f32 %v628_v11, %v222_v15  ;;  %v286_v29 = vmul.f32 %v626_v14, %v222_v15  ;;  %v328_v32 = vmul.f32 %v632_v23, %v222_v15  ;;  %v314_v33 = vmul.f32 %v630_v27, %v222_v15  ;;  %703 = vmatpush3.bf16.msra.mxu1 %v761_v42  ;;  %v773_v54 = vld [vmem:[#allocation12 + $0x38] sm:$0xff]   ;;  %v343_v55 = vld [vmem:[%s1140_s2] sm:$0xf] }
  0x64   :  { %685 = vmatpush3.bf16.msra.mxu0 %v752_v8  ;;  %v259_v21 = vsel %vm230_vm5, %v258_v17, -inf  ;;  %v231_v22 = vsel %vm230_vm5, %v229_v18, -inf  ;;  %v273_v25 = vsel %vm230_vm5, %v272_v19, -inf  ;;  %v245_v26 = vsel %vm230_vm5, %v244_v20, -inf  ;;  %704 = vmatprep.subr.bf16.mxu1 %v923_v1  ;;  %v609_v56 = vld [vmem:[%s1142_s4] ss:$0 sm:$0xff] }
  0x65   :  { %686 = vmatprep.subr.bf16.mxu0 %v923_v1  ;;  %260 = vmax.xlane.f32.xlu1 %v259_v21  ;;  %v301_v30 = vsel %vm230_vm5, %v300_v28, -inf  ;;  %v287_v31 = vsel %vm230_vm5, %v286_v29, -inf  ;;  %v329_v35 = vsel %vm230_vm5, %v328_v32, -inf  ;;  %v315_v36 = vsel %vm230_vm5, %v314_v33, -inf }
  0x66   :  { %232 = vmax.xlane.f32.xlu0 %v231_v22 }
  0x67   :  { %705 = vmatpush3.bf16.msra.mxu1 %v763_v44 }
  0x68   :  { %687 = vmatpush3.bf16.msra.mxu0 %v753_v12  ;;  %706 = vmatprep.subr.bf16.mxu1 %v923_v1 }
  0x69   :  { %688 = vmatprep.subr.bf16.mxu0 %v923_v1  ;;  %274 = vmax.xlane.f32.xlu1 %v273_v25 }
  0x6a   :  { %246 = vmax.xlane.f32.xlu0 %v245_v26 }
  0x6b   :  { %707 = vmatpush3.bf16.msra.mxu1 %v765_v46 }
  0x6c   :  { %689 = vmatpush3.bf16.msra.mxu0 %v754_v16  ;;  %708 = vmatprep.subr.bf16.mxu1 %v923_v1 }
  0x6d   :  { %690 = vmatprep.subr.bf16.mxu0 %v923_v1  ;;  %302 = vmax.xlane.f32.xlu1 %v301_v30 }
  0x6e   :  { %288 = vmax.xlane.f32.xlu0 %v287_v31 }
  0x6f   :  { %709 = vmatpush3.bf16.msra.mxu1 %v767_v48 }
  0x70   :  { %691 = vmatpush3.bf16.msra.mxu0 %v755_v24  ;;  %710 = vmatprep.subr.bf16.mxu1 %v923_v1 }
  0x71   :  { %692 = vmatprep.subr.bf16.mxu0 %v923_v1  ;;  %330 = vmax.xlane.f32.xlu1 %v329_v35 }
  0x72   :  { %316 = vmax.xlane.f32.xlu0 %v315_v36 }
  0x73   :  { %711 = vmatpush3.bf16.msra.mxu1 %v769_v50 }
  0x74   :  { %693 = vmatpush3.bf16.msra.mxu0 %v756_v34  ;;  %712 = vmatprep.subr.bf16.mxu1 %v923_v1 }
  0x75   :  { %694 = vmatprep.subr.bf16.mxu0 %v923_v1 }
  0x77   :  { %713 = vmatpush3.bf16.msra.mxu1 %v771_v52 }
  0x78   :  { %695 = vmatpush3.bf16.msra.mxu0 %v757_v37  ;;  %714 = vmatprep.subr.bf16.mxu1 %v923_v1 }
  0x79   :  { %720 = vmatprep.subr.bf16.mxu0 %v923_v1 }
  0x7b   :  { %697 = vmatmul.mubr.bf16.vlgmr.msra.gmra.mrb[0].mxu0 %v106_v38  ;;  %715 = vmatpush3.bf16.msra.mxu1 %v773_v54  ;;  %v650_v38 = vld [vmem:[%s1145_s7] ss:$0 sm:$0xff] }
  0x7c   :  { %721 = vmatpush3.bf16.msra.mxu0 %v758_v39  ;;  %736 = vmatprep.mubr.msk.bf16.mxu0 %vm924_vm0, %v923_v1 }
  0x7d   :  { %722 = vmatprep.subr.bf16.mxu0 %v923_v1 }
  0x80   :  { %723 = vmatpush3.bf16.msra.mxu0 %v760_v41 }
  0x81   :  { %724 = vmatprep.subr.bf16.mxu0 %v923_v1 }
  0x84   :  { %725 = vmatpush3.bf16.msra.mxu0 %v762_v43 }
  0x85   :  { %726 = vmatprep.subr.bf16.mxu0 %v923_v1 }
  0x88   :  { %727 = vmatpush3.bf16.msra.mxu0 %v764_v45 }
  0x89   :  { %728 = vmatprep.subr.bf16.mxu0 %v923_v1 }
  0x8c   :  { %729 = vmatpush3.bf16.msra.mxu0 %v766_v47 }
  0x8d   :  { %730 = vmatprep.subr.bf16.mxu0 %v923_v1 }
  0x90   :  { %731 = vmatpush3.bf16.msra.mxu0 %v768_v49 }
  0x91   :  { %732 = vmatprep.subr.bf16.mxu0 %v923_v1 }
  0x94   :  { %733 = vmatpush3.bf16.msra.mxu0 %v770_v51 }
  0x95   :  { %734 = vmatprep.subr.bf16.mxu0 %v923_v1 }
  0x98   :  { %735 = vmatpush3.bf16.msra.mxu0 %v772_v53  ;;  %v651_v53 = vld [vmem:[%s1146_s8] ss:$0 sm:$0xff] }
  0x9b   :  { %737 = vmatmul.mubr.bf16.vlgmr.msra.gmra.mrb[4].mxu0 %v343_v55  ;;  %v652_v55 = vld [vmem:[%s1147_s9] ss:$0 sm:$0xff] }
  0xf2   :  { %v261_v0 = vpop.xlane.xlu1 %260 }
  0xf3   :  { %v233_v63 = vpop.xlane.xlu0 %232 }
  0xf6   :  { %v275_v3 = vpop.xlane.xlu1 %274 }
  0xf7   :  { %v247_v1 = vpop.xlane.xlu0 %246 }
  0xfa   :  { %v303_v14 = vpop.xlane.xlu1 %302 }
  0xfb   :  { %v289_v11 = vpop.xlane.xlu0 %288 }
  0xfe   :  { %v331_v25 = vpop.xlane.xlu1 %330 }
  0xff   :  { %v317_v21 = vpop.xlane.xlu0 %316 }
 0x14e   :  { %v212_v57 = vpop.f32.mrb[0].mxu0 }
 0x14f   :  { %v213_v58 = vadd.f32 %v609_v56, %v212_v57  ;;  %v698_v59 = vpop.f32.mrb[1].mxu0 }
 0x150   :  { %v215_v60 = vpop.f32.mrb[2].mxu0 }
 0x151   :  { %v218_v61 = vmax.f32 %v213_v58, 0.0  ;;  %v699_v62 = vpop.f32.mrb[3].mxu0 }
 0x153   :  { %219 = vst [vmem:[#allocation3] sm:$0xff] %v218_v61 }
 0x15a   :  { %v619_v4 = vld [vmem:[#allocation3] ss:$0 sm:$0xff]  ;;  %v621_v5 = vld [vmem:[#allocation3 + $0x1] ss:$0 sm:$0xff]  ;;  %v623_v7 = vld [vmem:[#allocation3 + $0x2] ss:$0 sm:$0xff] }
 0x15b   :  { %v239_v6 = vmul.f32 %v619_v4, %v233_v63  ;;  %v253_v9 = vmul.f32 %v621_v5, %v247_v1  ;;  %v625_v10 = vld [vmem:[#allocation3 + $0x3] ss:$0 sm:$0xff]  ;;  %v267_v13 = vmul.f32 %v623_v7, %v261_v0  ;;  %v627_v15 = vld [vmem:[#allocation3 + $0x4] ss:$0 sm:$0xff]  ;;  %v629_v18 = vld [vmem:[#allocation3 + $0x5] ss:$0 sm:$0xff] }
 0x15c   :  { %v281_v16 = vmul.f32 %v625_v10, %v275_v3  ;;  %v295_v20 = vmul.f32 %v627_v15, %v289_v11  ;;  %v631_v22 = vld [vmem:[#allocation3 + $0x6] ss:$0 sm:$0xff]  ;;  %v309_v23 = vmul.f32 %v629_v18, %v303_v14  ;;  %v633_v26 = vld [vmem:[#allocation3 + $0x7] ss:$0 sm:$0xff] }
 0x15d   :  { %v240_v8 = vmax.f32 %v239_v6, 0.0  ;;  %v323_v28 = vmul.f32 %v631_v22, %v317_v21  ;;  %v337_v29 = vmul.f32 %v633_v26, %v331_v25 }
 0x15f   :  { %v254_v12 = vmax.f32 %v240_v8, %v253_v9 }
 0x161   :  { %v268_v17 = vmax.f32 %v254_v12, %v267_v13 }
 0x163   :  { %v282_v19 = vmax.f32 %v268_v17, %v281_v16 }
 0x165   :  { %v296_v24 = vmax.f32 %v282_v19, %v295_v20 }
 0x167   :  { %v310_v27 = vmax.f32 %v296_v24, %v309_v23 }
 0x169   :  { %v324_v30 = vmax.f32 %v310_v27, %v323_v28 }
 0x16b   :  { %v338_v31 = vmax.f32 %v324_v30, %v337_v29 }
 0x16d   :  { %v361_v32 = vpack.c.bf16 %v338_v31, %v338_v31 }
 0x16e   :  { %v548_v33 = vpop.f32.mrb[4].mxu0 }
 0x16f   :  { %717 = vmatmul.mubr.bf16.vlgmr.msra.gmra.mrb[0].mxu1 %v361_v32  ;;  %v738_v34 = vpop.f32.mrb[5].mxu0 }
 0x170   :  { %v551_v35 = vpop.f32.mrb[6].mxu0 }
 0x171   :  { %v739_v36 = vpop.f32.mrb[7].mxu0 }
 0x242   :  { %v460_v37 = vpop.f32.mrb[0].mxu1 }
 0x243   :  { %v549_v39 = vadd.f32 %v548_v33, %v460_v37  ;;  %v718_v40 = vpop.f32.mrb[1].mxu1 }
 0x244   :  { %v463_v41 = vpop.f32.mrb[2].mxu1 }
 0x245   :  { %v719_v42 = vpop.f32.mrb[3].mxu1  ;;  %v561_v43 = vadd.f32 %v650_v38, %v549_v39 }
 0x247   :  { %562 = vadd.xlane.f32.xlu0 %v561_v43 }
 0x2d4   :  { %v563_v44 = vpop.xlane.xlu0 %562 }
 0x2d5   :  { %v564_v45 = vmul.f32 0.03125, %v563_v44 }
 0x2d7   :  { %v566_v46 = vsub.f32 %v561_v43, %v564_v45 }
 0x2d9   :  { %v567_v47 = vsel %vm565_vm10, %v566_v46, 0.0 }
 0x2da   :  { %v568_v48 = vmul.f32 %v567_v47, %v567_v47 }
 0x2dc   :  { %569 = vadd.xlane.f32.xlu1 %v568_v48 }
 0x369   :  { %v570_v49 = vpop.xlane.xlu1 %569 }
 0x36a   :  { %v571_v50 = vmul.f32 0.03125, %v570_v49 }
 0x36c   :  { %v572_v51 = vadd.f32 1e-05, %v571_v50 }
 0x36e   :  { %774 = vrsqrt.f32 %v572_v51 }
 0x378   :  { %v775_v52 = vpop.eup %774 }
 0x379   :  { %v574_v54 = vmul.f32 %v775_v52, %v567_v47 }
 0x37b   :  { %v582_v2 = vmul.f32 %v651_v53, %v574_v54 }
 0x37d   :  { %v590_v56 = vadd.f32 %v652_v55, %v582_v2 }
 0x37f   :  { %591 = vst [vmem:[#allocation13] sm:$0xff] %v590_v56 }
 0x380   :  { %897 = shalt.err (!%p894_p2)
}
 0x381   :  { %s898_s21 = scalar_lea.hbm %s1148_s10, 128 }
 0x382   :  { %p899_p3 = scmp.ne.s32.totalorder %s1148_s10, %s898_s21  ;;  %p902_p4 = scmp.lt.u32.totalorder %s898_s21, %s1148_s10 }
 0x384   :  { %p904_p5 = pnand %p902_p4, %p899_p3 }
 0x386   :  { %907 = shalt.err (!%p904_p5)
}
 0x387   :  { %601 = dma.vmem_to_hbm [thread:$0]  %s599_s18, 128, %s1148_s10, [#allocation6]  }
 0x388   :  { %914 = dma.done.wait [#allocation6], 128  }
 0x389   :  { %915 = vsyncadd [#allocation6], 4294967168 }
 0x38a   :  { %605 = vsyncpa [#allocation5], 1 }
 0x38b   :  { %606 = vsyncpa [#allocation8], 1 }
 0x38c   :  { %607 = vsyncpa [#allocation11], 1 }
 0x38d   :  { %608 = vsyncpa [#allocation6], 1 }

</bundles_post_ra>
